<compile_context>
chip_gen: v7x
topology: tpu7x:2x2x1
jax: 0.10.0
libtpu: 0.0.40
codegen_flags: <defaults>
</compile_context>

<pallas_src>
import functools

import jax
import jax.numpy as jnp
from jax.experimental import pallas as pl
from jax.experimental.pallas import tpu as pltpu


def _ce_boundary_kernel(logits_ref, out_ref, acc_ref, *,
                        class_a, class_b, w_a, w_b, t_w, tile_n, total_n):
    i = pl.program_id(0)

    @pl.when(i == 0)
    def _():
        acc_ref[...] = jnp.zeros_like(acc_ref)

    x = logits_ref[...].astype(jnp.float32)                       # (TN, C)

    # numerically-stable logsumexp per row
    m = jnp.max(x, axis=-1, keepdims=True)                        # (TN, 1)
    lse = m + jnp.log(jnp.sum(jnp.exp(x - m), axis=-1, keepdims=True))

    # static lane slices for the two boundary classes (class_a/b are Python ints)
    xa = x[:, class_a:class_a + 1]                                # (TN, 1)
    xb = x[:, class_b:class_b + 1]                                # (TN, 1)
    row_loss = t_w * lse - (w_a * xa + w_b * xb)                  # (TN, 1)

    # mask rows that are padding (N need not be a multiple of tile_n)
    row = jax.lax.broadcasted_iota(jnp.int32, (tile_n, 1), 0) + i * tile_n
    row_loss = jnp.where(row < total_n, row_loss, 0.0)

    acc_ref[...] += row_loss                                      # per-row partials

    @pl.when(i == pl.num_programs(0) - 1)
    def _():
        out_ref[0, 0] = jnp.sum(acc_ref[...]) / jnp.float32(total_n)


def cross_entropy_boundary(logits, class_a, class_b, *, tile_n=None):
    """logits: [N, C] float array. Returns scalar mean soft-label CE loss (f32)."""
    n, c = logits.shape
    class_a = int(class_a)
    class_b = int(class_b)

    itemsize = jnp.dtype(logits.dtype).itemsize
    sub = {4: 8, 2: 16, 1: 32}.get(itemsize, 8)     # sublane packing per dtype

    if tile_n is None:
        # Largest batch tile that keeps a double-buffered input comfortably
        # inside scoped VMEM on every generation (incl. v7x's 64 MiB physical).
        budget_per_buffer = 4 * 1024 * 1024
        max_rows = max(sub, (budget_per_buffer // (c * itemsize)) // sub * sub)
        n_rounded = pl.cdiv(n, sub) * sub
        tile_n = int(min(max_rows, n_rounded, 2048))
    tile_n = max(sub, (int(tile_n) // sub) * sub)

    num_tiles = int(pl.cdiv(n, tile_n))
    n_pad = num_tiles * tile_n
    if n_pad != n:
        logits = jnp.pad(logits, ((0, n_pad - n), (0, 0)))

    # PyTorch's target[:, [a, b]] = 0.5 writes 0.5 only once when a == b.
    if class_a == class_b:
        w_a, w_b, t_w = 0.5, 0.0, 0.5
    else:
        w_a, w_b, t_w = 0.5, 0.5, 1.0

    kernel = functools.partial(
        _ce_boundary_kernel,
        class_a=class_a, class_b=class_b,
        w_a=w_a, w_b=w_b, t_w=t_w,
        tile_n=tile_n, total_n=n)

    out = pl.pallas_call(
        kernel,
        out_shape=jax.ShapeDtypeStruct((1, 1), jnp.float32),
        grid_spec=pltpu.PrefetchScalarGridSpec(
            num_scalar_prefetch=0,
            grid=(num_tiles,),
            in_specs=[pl.BlockSpec((tile_n, c), lambda i: (i, 0))],
            out_specs=pl.BlockSpec(
                (1, 1), lambda i: (0, 0), memory_space=pltpu.SMEM),
            scratch_shapes=[pltpu.VMEM((tile_n, 1), jnp.float32)]),
        compiler_params=pltpu.CompilerParams(
            dimension_semantics=("arbitrary",),
            vmem_limit_bytes=32 * 1024 * 1024),
    )(logits)
    return out[0, 0]


def _reference(logits, class_a, class_b):
    logits = logits.astype(jnp.float32)
    logp = jax.nn.log_softmax(logits, axis=-1)
    tgt = jnp.zeros_like(logits).at[:, class_a].set(0.5).at[:, class_b].set(0.5)
    return jnp.mean(-jnp.sum(tgt * logp, axis=-1))


if __name__ == "__main__":
    key = jax.random.PRNGKey(0)

    # Small shapes consistent with the module: N graphs x C classes.
    N, C = 16, 8
    class_a, class_b = 1, 5
    logits = jax.random.normal(key, (N, C), dtype=jnp.float32)

    loss = jax.block_until_ready(cross_entropy_boundary(logits, class_a, class_b))
    ref = _reference(logits, class_a, class_b)
    assert jnp.allclose(loss, ref, atol=1e-5, rtol=1e-5), (loss, ref)

    # Ragged batch (N not a multiple of the tile) + multi-step accumulation.
    N2 = 37
    logits2 = jax.random.normal(jax.random.PRNGKey(1), (N2, C), dtype=jnp.float32)
    loss2 = jax.block_until_ready(
        cross_entropy_boundary(logits2, class_a, class_b, tile_n=8))
    ref2 = _reference(logits2, class_a, class_b)
    assert jnp.allclose(loss2, ref2, atol=1e-5, rtol=1e-5), (loss2, ref2)

    # class_a == class_b edge case (PyTorch last-write-wins semantics).
    loss3 = jax.block_until_ready(cross_entropy_boundary(logits, 3, 3))
    ref3 = _reference(logits, 3, 3)
    assert jnp.allclose(loss3, ref3, atol=1e-5, rtol=1e-5), (loss3, ref3)

    print("KERNEL_OK")
</pallas_src>

<mosaic_0001>
module attributes {stable_mosaic.version = 11 : i64} {
  func.func @_ce_boundary_kernel(%arg0: i32, %arg1: memref<16x8xf32, #tpu.memory_space<vmem>>, %arg2: memref<1x1xf32, #tpu.memory_space<smem>>, %arg3: memref<16x1xf32, #tpu.memory_space<vmem>>) attributes {dimension_semantics = [#tpu.dimension_semantics<arbitrary>], iteration_bounds = array<i64: 1>, scalar_prefetch = 0 : i64, scratch_operands = 1 : i64, tpu.core_type = #tpu.core_type<tc>, window_params = [{transform_indices = @transform_0, window_bounds = array<i64: 16, 8>}, {transform_indices = @transform_1, window_bounds = array<i64: 1, 1>}]} {
    %c0_i32 = arith.constant 0 : i32
    %0 = arith.cmpi eq, %arg0, %c0_i32 : i32
    %1 = arith.extui %0 : i1 to i32
    %c0_i32_0 = arith.constant 0 : i32
    %2 = arith.cmpi ne, %1, %c0_i32_0 : i32
    scf.if %2 {
      %cst_14 = arith.constant 0.000000e+00 : f32
      %37 = vector.broadcast %cst_14 : f32 to vector<16x1xf32>
      %c0_15 = arith.constant 0 : index
      %c0_16 = arith.constant 0 : index
      %38 = vector.load %arg3[%c0_15, %c0_16] : memref<16x1xf32, #tpu.memory_space<vmem>>, vector<16x1xf32>
      tpu.vector_store %arg3[%c0_15, %c0_16], %37 {strides = array<i32>} : memref<16x1xf32, #tpu.memory_space<vmem>>, vector<16x1xf32>,
    } else {
    }
    %c0 = arith.constant 0 : index
    %c0_1 = arith.constant 0 : index
    %3 = vector.load %arg1[%c0, %c0_1] : memref<16x8xf32, #tpu.memory_space<vmem>>, vector<16x8xf32>
    %cst = arith.constant dense<0xFF800000> : vector<16xf32>
    %4 = vector.multi_reduction <maximumf>, %3, %cst [1] : vector<16x8xf32> to vector<16xf32>
    %5 = vector.shape_cast %4 : vector<16xf32> to vector<16x1xf32>
    %6 = vector.broadcast %5 : vector<16x1xf32> to vector<16x8xf32>
    %7 = arith.subf %3, %6 : vector<16x8xf32>
    %8 = math.exp %7 : vector<16x8xf32>
    %cst_2 = arith.constant dense<0.000000e+00> : vector<16xf32>
    %9 = vector.multi_reduction <add>, %8, %cst_2 [1] : vector<16x8xf32> to vector<16xf32>
    %10 = vector.shape_cast %9 : vector<16xf32> to vector<16x1xf32>
    %11 = math.log %10 : vector<16x1xf32>
    %12 = arith.addf %5, %11 : vector<16x1xf32>
    %13 = vector.extract_strided_slice %3 {offsets = [0, 1], sizes = [16, 1], strides = [1, 1]} : vector<16x8xf32> to vector<16x1xf32>
    %14 = vector.extract_strided_slice %3 {offsets = [0, 5], sizes = [16, 1], strides = [1, 1]} : vector<16x8xf32> to vector<16x1xf32>
    %cst_3 = arith.constant 1.000000e+00 : f32
    %15 = vector.broadcast %cst_3 : f32 to vector<16x1xf32>
    %16 = arith.mulf %15, %12 : vector<16x1xf32>
    %cst_4 = arith.constant 5.000000e-01 : f32
    %17 = vector.broadcast %cst_4 : f32 to vector<16x1xf32>
    %18 = arith.mulf %17, %13 : vector<16x1xf32>
    %cst_5 = arith.constant 5.000000e-01 : f32
    %19 = vector.broadcast %cst_5 : f32 to vector<16x1xf32>
    %20 = arith.mulf %19, %14 : vector<16x1xf32>
    %21 = arith.addf %18, %20 : vector<16x1xf32>
    %22 = arith.subf %16, %21 : vector<16x1xf32>
    %23 = tpu.iota {dimensions = array<i32: 0>} : vector<16x1xi32>
    %c16_i32 = arith.constant 16 : i32
    %24 = arith.muli %arg0, %c16_i32 : i32
    %25 = vector.broadcast %24 : i32 to vector<16x1xi32>
    %26 = arith.addi %23, %25 : vector<16x1xi32>
    %c16_i32_6 = arith.constant 16 : i32
    %27 = vector.broadcast %c16_i32_6 : i32 to vector<16x1xi32>
    %28 = arith.cmpi slt, %26, %27 : vector<16x1xi32>
    %cst_7 = arith.constant 0.000000e+00 : f32
    %29 = vector.broadcast %cst_7 : f32 to vector<16x1xf32>
    %30 = arith.select %28, %22, %29 : vector<16x1xi1>, vector<16x1xf32>
    %c0_8 = arith.constant 0 : index
    %c0_9 = arith.constant 0 : index
    %31 = vector.load %arg3[%c0_8, %c0_9] : memref<16x1xf32, #tpu.memory_space<vmem>>, vector<16x1xf32>
    %32 = arith.addf %31, %30 : vector<16x1xf32>
    %c0_10 = arith.constant 0 : index
    %c0_11 = arith.constant 0 : index
    %33 = vector.load %arg3[%c0_10, %c0_11] : memref<16x1xf32, #tpu.memory_space<vmem>>, vector<16x1xf32>
    tpu.vector_store %arg3[%c0_10, %c0_11], %32 {strides = array<i32>} : memref<16x1xf32, #tpu.memory_space<vmem>>, vector<16x1xf32>,
    %c0_i32_12 = arith.constant 0 : i32
    %34 = arith.cmpi eq, %arg0, %c0_i32_12 : i32
    %35 = arith.extui %34 : i1 to i32
    %c0_i32_13 = arith.constant 0 : i32
    %36 = arith.cmpi ne, %35, %c0_i32_13 : i32
    scf.if %36 {
      %c0_14 = arith.constant 0 : index
      %c0_15 = arith.constant 0 : index
      %37 = vector.load %arg3[%c0_14, %c0_15] : memref<16x1xf32, #tpu.memory_space<vmem>>, vector<16x1xf32>
      %38 = vector.shape_cast %37 : vector<16x1xf32> to vector<1x16x1xf32>
      %cst_16 = arith.constant dense<0.000000e+00> : vector<1xf32>
      %39 = vector.multi_reduction <add>, %38, %cst_16 [1, 2] : vector<1x16x1xf32> to vector<1xf32>
      %40 = vector.shape_cast %39 : vector<1xf32> to vector<1x1x1xf32>
      %41 = vector.extract %40[0, 0, 0] : f32 from vector<1x1x1xf32>
      %cst_17 = arith.constant 1.600000e+01 : f32
      %42 = arith.divf %41, %cst_17 : f32
      %c0_18 = arith.constant 0 : index
      %c0_19 = arith.constant 0 : index
      %43 = memref.load %arg2[%c0_18, %c0_19] : memref<1x1xf32, #tpu.memory_space<smem>>
      memref.store %42, %arg2[%c0_18, %c0_19] : memref<1x1xf32, #tpu.memory_space<smem>>
    } else {
    }
    return
  }
  func.func @transform_0(%arg0: i32) -> (i32, i32) {
    %c0_i32 = arith.constant 0 : i32
    %c0_i32_0 = arith.constant 0 : i32
    return %arg0, %c0_i32 : i32, i32
  }
  func.func @transform_1(%arg0: i32) -> (i32, i32) {
    %c0_i32 = arith.constant 0 : i32
    %c0_i32_0 = arith.constant 0 : i32
    %c0_i32_1 = arith.constant 0 : i32
    return %c0_i32, %c0_i32_0 : i32, i32
  }
}

</mosaic_0001>

<bundles_post_ra>
// kernel: tpu_custom_call.1
= control target key start
LH: loop header
LB: loop body
LE: loop exit
PB: predicated region body
PF: predicated region fallthrough
CT: control target
= control target key end

     0   :  { %vm18_vm0 = vcmask 64512   ;;  %s186_s0 = inlined_call_operand.vmem [shape: f32[16,8], index: 0, kind: input, shape index: {}]   ;;  %s187_s1 = inlined_call_operand.hbm [shape: f32[1,1], index: 1, kind: output, shape index: {}]  }
   0x1   :  { %v16_v0 = vld [vmem:[%s186_s0] sm:$0xff]  ;;  %v17_v1 = vld [vmem:[%s186_s0 + $0x8] sm:$0xff] }
   0x2   :  { %6 = vsyncpa [#allocation4], 0  ;;  %v19_v2 = vsel %vm18_vm0, %v16_v0, -inf  ;;  %v22_v3 = vsel %vm18_vm0, %v17_v1, -inf  ;;  %v43_v4 = vmul.f32 0.5, %v16_v0  ;;  %s144_s10 = smov 124  }
   0x3   :  { %20 = vmax.xlane.f32.xlu0 %v19_v2  ;;  %v44_v15 = vmul.f32 0.5, %v17_v1  ;;  %vm13_vm1 = vcmask 7168   ;;  %v145_v16 = vmov 0.0   ;;  %s146_s0 = smov 127   ;;  %s132_s15 = scalar_lea.hbm %s187_s1, 16 }
   0x4   :  { %14 = vst.msk [vmem:[#allocation2] sm:$0xff] %vm13_vm1, %v145_v16  ;;  %15 = vst.msk [vmem:[#allocation2 + $0x8] sm:$0xff] %vm13_vm1, %v145_v16  ;;  %p133_p0 = scmp.ne.s32.totalorder %s187_s1, %s132_s15  ;;  %p136_p1 = scmp.lt.u32.totalorder %s132_s15, %s187_s1 }
   0x6   :  { %p138_p2 = pnand %p136_p1, %p133_p0 }
   0x7   :  { %23 = vmax.xlane.f32.xlu0 %v22_v3 }
   0xb   :  { %v68_v31 = vld [vmem:[#allocation2] sm:$0xff]  ;;  %v69_v34 = vld [vmem:[#allocation2 + $0x8] sm:$0xff] }
  0x1d   :  { %47 = vrot.lane.b32.xlu0 %v43_v4, %s144_s10 }
  0x90   :  { %v21_v5 = vpop.xlane.xlu0 %20 }
  0x91   :  { %v25_v6 = vsub.f32 %v16_v0, %v21_v5 }
  0x93   :  { %v27_v7 = vmul.f32 1.442695, %v25_v6 }
  0x94   :  { %v24_v8 = vpop.xlane.xlu0 %23 }
  0x95   :  { %124 = vpow2.f32 %v27_v7  ;;  %v26_v9 = vsub.f32 %v17_v1, %v24_v8 }
  0x97   :  { %v29_v10 = vmul.f32 1.442695, %v26_v9 }
  0x98   :  { %v48_v19 = vpop.permute.xlu0 %47 }
  0x99   :  { %126 = vpow2.f32 %v29_v10  ;;  %v53_v22 = vadd.f32 %v48_v19, %v43_v4 }
  0x9f   :  { %v125_v11 = vpop.eup %124 }
  0xa0   :  { %v31_v12 = vsel %vm18_vm0, %v125_v11, 0.0 }
  0xa1   :  { %32 = vadd.xlane.f32.xlu1 %v31_v12 }
  0xa3   :  { %v127_v13 = vpop.eup %126 }
  0xa4   :  { %v34_v14 = vsel %vm18_vm0, %v127_v13, 0.0 }
  0xa5   :  { %35 = vadd.xlane.f32.xlu1 %v34_v14 }
  0xb6   :  { %49 = vrot.lane.b32.xlu1 %v44_v15, %s144_s10 }
 0x12e   :  { %v33_v17 = vpop.xlane.xlu1 %32 }
 0x12f   :  { %128 = vlog2.f32 %v33_v17 }
 0x132   :  { %v36_v18 = vpop.xlane.xlu1 %35 }
 0x133   :  { %130 = vlog2.f32 %v36_v18 }
 0x136   :  { %v50_v23 = vpop.permute.xlu1 %49 }
 0x137   :  { %v54_v28 = vadd.f32 %v50_v23, %v44_v15 }
 0x139   :  { %v129_v20 = vpop.eup %128 }
 0x13a   :  { %v38_v21 = vmul.f32 0.6931472, %v129_v20 }
 0x13c   :  { %v41_v24 = vadd.f32 %v38_v21, %v21_v5 }
 0x13d   :  { %v131_v25 = vpop.eup %130 }
 0x13e   :  { %v40_v26 = vmul.f32 0.6931472, %v131_v25  ;;  %v55_v27 = vsub.f32 %v41_v24, %v53_v22 }
 0x140   :  { %v42_v29 = vadd.f32 %v40_v26, %v24_v8  ;;  %72 = vrot.lane.b32.xlu1 %v55_v27, %s146_s0 }
 0x142   :  { %v56_v30 = vsub.f32 %v42_v29, %v54_v28 }
 0x144   :  { %74 = vrot.lane.b32.xlu1 %v56_v30, %s146_s0 }
 0x1b2   :  { %v73_v32 = vpop.permute.xlu1 %72 }
 0x1b3   :  { %v78_v33 = vadd.f32 %v73_v32, %v68_v31 }
 0x1b5   :  { %81 = vst.msk [vmem:[#allocation2] sm:$0xff] %vm13_vm1, %v78_v33 }
 0x1b6   :  { %v75_v35 = vpop.permute.xlu1 %74 }
 0x1b7   :  { %v79_v36 = vadd.f32 %v75_v35, %v69_v34 }
 0x1b9   :  { %82 = vst.msk [vmem:[#allocation2 + $0x8] sm:$0xff] %vm13_vm1, %v79_v36 }
 0x1bc   :  { %v86_v37 = vld [vmem:[#allocation2] sm:$0xff] }
 0x1bd   :  { %v88_v39 = vsel %vm13_vm1, %v86_v37, 0.0 }
 0x1c0   :  { %v87_v38 = vld [vmem:[#allocation2 + $0x8] sm:$0xff] }
 0x1c1   :  { %v89_v40 = vsel %vm13_vm1, %v87_v38, 0.0 }
 0x1c2   :  { %v90_v41 = vadd.f32 %v89_v40, %v88_v39 }
 0x1c4   :  { %91 = vadd.xlane.f32.xlu0 %v90_v41 }
 0x251   :  { %v92_v42 = vpop.xlane.xlu0 %91 }
 0x252   :  { %v93_v43 = vrot.slane %v92_v42, 4 }
 0x254   :  { %v94_v44 = vadd.f32 %v93_v43, %v92_v42 }
 0x256   :  { %v95_v45 = vrot.slane %v94_v44, 2 }
 0x258   :  { %v96_v46 = vadd.f32 %v95_v45, %v94_v44 }
 0x25a   :  { %v97_v47 = vrot.slane %v96_v46, 1 }
 0x25c   :  { %v98_v48 = vadd.f32 %v97_v47, %v96_v46 }
 0x25e   :  { %118 = vpush %v98_v48 }
 0x28f   :  { %s119_s11 = spop %118 }
 0x290   :  { %s102_s12 = smul.f32 0.0625, %s119_s11 }
 0x292   :  { %104 = sst [smem:[#allocation3]] %s102_s12 }
 0x293   :  { %141 = shalt.err (!%p138_p2)
}
 0x294   :  { %s147_s20 = smov [#allocation3]  }
 0x295   :  { %112 = dma.smem_to_hbm %s147_s20, 16, %s187_s1, [#allocation4]  }
 0x296   :  { %142 = dma.done.wait [#allocation4], 16  }
 0x297   :  { %143 = vsyncadd [#allocation4], 4294967280 }
 0x298   :  { %116 = sfence }
 0x299   :  { %117 = vsyncpa [#allocation4], 1 }

</bundles_post_ra>
